<compile_context>
chip_gen: v5e
topology: v5e:2x2
jax: 0.10.0
libtpu: 0.0.40
codegen_flags: <defaults>
</compile_context>

<pallas_src>
import jax
import jax.numpy as jnp
from jax.experimental import pallas as pl
from jax.experimental.pallas import tpu as pltpu


_LANE = 128


# ----------------------------- Pallas kernel -------------------------------

def _gcn2_fused_kernel(a_ref, x_ref, w1_ref, b1_ref, w2_ref, b2_ref, o_ref):
    """Fused 2-layer GCN, single invocation (no grid).

    out = A_hat @ relu(A_hat @ (X @ W1) + b1) @ W2 + b2
    All operands are whole-array VMEM resident; dots take the full K dim.
    """
    f32 = jnp.float32
    bf16 = jnp.bfloat16

    # ----- layer 1: H = relu(A_hat @ (X @ W1) + b1) --------------------------
    xw1 = jnp.dot(x_ref[...], w1_ref[...], preferred_element_type=f32)
    h = jnp.dot(a_ref[...], xw1.astype(bf16), preferred_element_type=f32)
    h = jnp.maximum(h + b1_ref[...], 0.0).astype(bf16)

    # ----- layer 2: out = A_hat @ (H @ W2) + b2 -------------------------------
    hw2 = jnp.dot(h, w2_ref[...], preferred_element_type=f32).astype(bf16)
    out = jnp.dot(a_ref[...], hw2, preferred_element_type=f32) + b2_ref[...]
    o_ref[...] = out.astype(o_ref.dtype)


# ------------------------- one-time preprocessing ---------------------------

def prepare_gcn_inputs(x, a_hat, params):
    """One-time cast/pad of operands (amortized across repeated forward calls).

    Returns a dict of kernel-ready arrays:
      a:  [N, N]          bf16  normalized adjacency
      x:  [N, C_in]       bf16  features
      w1: [C_in, H]       bf16
      b1: [1, H]          f32
      w2: [H, C_out_p]    bf16  (zero-padded to lane-dense width)
      b2: [1, C_out_p]    f32   (zero-padded)
      c_out: int          true output width
    """
    N, c_in = x.shape
    hidden = params["w1"].shape[1]
    c_out = params["w2"].shape[1]
    c_out_p = ((c_out + _LANE - 1) // _LANE) * _LANE   # lane-dense output slab

    assert a_hat.shape == (N, N), (a_hat.shape, N)
    assert c_in % _LANE == 0 and hidden % _LANE == 0, (c_in, hidden)

    w2_pad = (jnp.zeros((hidden, c_out_p), jnp.float32)
              .at[:, :c_out].set(params["w2"]))
    b2_pad = (jnp.zeros((1, c_out_p), jnp.float32)
              .at[0, :c_out].set(params["b2"]))

    return {
        "a": a_hat.astype(jnp.bfloat16),
        "x": x.astype(jnp.bfloat16),
        "w1": params["w1"].astype(jnp.bfloat16),
        "b1": params["b1"].reshape(1, hidden).astype(jnp.float32),
        "w2": w2_pad.astype(jnp.bfloat16),
        "b2": b2_pad,
        "c_out": c_out,
    }


# ------------------------------ fused forward --------------------------------

def gcn_forward_prepared(prep):
    """Run the fused 2-layer GCN on pre-cast/pre-padded inputs."""
    N = prep["x"].shape[0]
    c_out_p = prep["w2"].shape[1]
    c_out = prep["c_out"]

    vmem = pl.BlockSpec(memory_space=pltpu.MemorySpace.VMEM)

    out_p = pl.pallas_call(
        _gcn2_fused_kernel,
        out_shape=jax.ShapeDtypeStruct((N, c_out_p), jnp.float32),
        in_specs=[vmem] * 6,      # whole-array VMEM resident, single invocation
        out_specs=vmem,
    )(prep["a"], prep["x"], prep["w1"], prep["b1"], prep["w2"], prep["b2"])

    return out_p[:, :c_out]


def gcn_forward_fused(x, a_hat, params):
    """Convenience one-shot path: prepare + run (for a single call)."""
    return gcn_forward_prepared(prepare_gcn_inputs(x, a_hat, params))


# ------------------------------- GCN glue -----------------------------------

def gcn_norm_dense(edge_index, num_nodes, edge_weight=None, dtype=jnp.bfloat16):
    """Dense D^-1/2 (A + I) D^-1/2 with A[dst, src] = edge weight.

    Normalization is computed in f32; the result is emitted directly in the
    kernel operand dtype (bf16) so no per-call cast is needed.
    """
    src, dst = edge_index[0], edge_index[1]
    if edge_weight is None:
        edge_weight = jnp.ones(src.shape, dtype=jnp.float32)
    A = jnp.zeros((num_nodes, num_nodes), jnp.float32)
    A = A.at[dst, src].add(edge_weight)
    A = A + jnp.eye(num_nodes, dtype=jnp.float32)       # self loops
    deg = A.sum(axis=1)                                  # in-degree (per dst)
    dis = jnp.where(deg > 0, jax.lax.rsqrt(deg), 0.0)
    return (dis[:, None] * A * dis[None, :]).astype(dtype)


def init_params(key, in_channels, hidden_channels, out_channels):
    k1, k2 = jax.random.split(key)

    def glorot(k, fan_in, fan_out):
        s = jnp.sqrt(6.0 / (fan_in + fan_out))
        return jax.random.uniform(k, (fan_in, fan_out), jnp.float32, -s, s)

    return {
        "w1": glorot(k1, in_channels, hidden_channels),
        "b1": jnp.zeros((hidden_channels,), jnp.float32),
        "w2": glorot(k2, hidden_channels, out_channels),
        "b2": jnp.zeros((out_channels,), jnp.float32),
    }


def _ref_forward_bf16(x, a_hat_bf16, params):
    """Pure-JAX reference mirroring the kernel's bf16-operand / f32-acc path."""
    bf = jnp.bfloat16
    f32 = jnp.float32
    a = a_hat_bf16.astype(bf)
    xw1 = jnp.dot(x.astype(bf), params["w1"].astype(bf),
                  preferred_element_type=f32)
    h = jnp.dot(a, xw1.astype(bf), preferred_element_type=f32) + params["b1"]
    h = jnp.maximum(h, 0.0).astype(bf)
    hw2 = jnp.dot(h, params["w2"].astype(bf),
                  preferred_element_type=f32).astype(bf)
    return jnp.dot(a, hw2, preferred_element_type=f32) + params["b2"]


def _ref_forward_f32(x, a_hat_f32, params):
    h = jnp.maximum(a_hat_f32 @ (x @ params["w1"]) + params["b1"], 0.0)
    return a_hat_f32 @ (h @ params["w2"]) + params["b2"]


# --------------------------------- main --------------------------------------

if __name__ == "__main__":
    N_NODES = 256
    N_EDGES = 2048
    IN_CH, HIDDEN_CH, OUT_CH = 128, 128, 64

    root = jax.random.PRNGKey(0)
    kx, ke1, ke2, kp = jax.random.split(root, 4)

    x = jax.random.normal(kx, (N_NODES, IN_CH), jnp.float32)
    src = jax.random.randint(ke1, (N_EDGES,), 0, N_NODES)
    dst = jax.random.randint(ke2, (N_EDGES,), 0, N_NODES)
    dst = jnp.where(dst == src, (dst + 1) % N_NODES, dst)  # no explicit self loops
    edge_index = jnp.stack([src, dst], axis=0)

    params = init_params(kp, IN_CH, HIDDEN_CH, OUT_CH)

    # One-time preprocessing: normalized adjacency emitted in bf16, params
    # pre-cast / pre-padded — amortized over repeated forward calls.
    a_hat_f32 = gcn_norm_dense(edge_index, N_NODES, dtype=jnp.float32)
    a_hat_bf = a_hat_f32.astype(jnp.bfloat16)
    prep = prepare_gcn_inputs(x, a_hat_bf, params)

    out = gcn_forward_prepared(prep)
    out = jax.block_until_ready(out)
    assert out.shape == (N_NODES, OUT_CH)

    # Tight check vs a reference using the same bf16-operand / f32-acc math.
    ref_bf = _ref_forward_bf16(x, a_hat_bf, params)
    assert jnp.allclose(out, ref_bf, atol=1e-2, rtol=1e-2), \
        "mismatch vs bf16-path reference"

    # Loose sanity check vs the full-f32 reference (bf16 operand rounding).
    ref_f32 = _ref_forward_f32(x, a_hat_f32, params)
    assert jnp.allclose(out, ref_f32, atol=1e-1, rtol=5e-2), \
        "mismatch vs f32 reference"

    print("KERNEL_OK")
</pallas_src>

<mosaic_0001>
module attributes {stable_mosaic.version = 11 : i64} {
  func.func @_gcn2_fused_kernel(%arg0: memref<256x256xbf16, #tpu.memory_space<vmem>>, %arg1: memref<256x128xbf16, #tpu.memory_space<vmem>>, %arg2: memref<128x128xbf16, #tpu.memory_space<vmem>>, %arg3: memref<1x128xf32, #tpu.memory_space<vmem>>, %arg4: memref<128x128xbf16, #tpu.memory_space<vmem>>, %arg5: memref<1x128xf32, #tpu.memory_space<vmem>>, %arg6: memref<256x128xf32, #tpu.memory_space<vmem>>) attributes {dimension_semantics = [], scalar_prefetch = 0 : i64, scratch_operands = 0 : i64, tpu.core_type = #tpu.core_type<tc>} {
    %c0 = arith.constant 0 : index
    %c0_0 = arith.constant 0 : index
    %0 = vector.load %arg1[%c0, %c0_0] : memref<256x128xbf16, #tpu.memory_space<vmem>>, vector<256x128xbf16>
    %c0_1 = arith.constant 0 : index
    %c0_2 = arith.constant 0 : index
    %1 = vector.load %arg2[%c0_1, %c0_2] : memref<128x128xbf16, #tpu.memory_space<vmem>>, vector<128x128xbf16>
    %cst = arith.constant dense<0.000000e+00> : vector<256x128xf32>
    %2 = tpu.matmul %0, %1, %cst {dimension_numbers = #tpu.dot_dimension_numbers<[1], [0], [0], [1], [0, 0, 1, 1], [], []>} : vector<256x128xbf16>, vector<128x128xbf16>, vector<256x128xf32> -> vector<256x128xf32>
    %c0_3 = arith.constant 0 : index
    %c0_4 = arith.constant 0 : index
    %3 = vector.load %arg0[%c0_3, %c0_4] : memref<256x256xbf16, #tpu.memory_space<vmem>>, vector<256x256xbf16>
    %4 = arith.truncf %2 : vector<256x128xf32> to vector<256x128xbf16>
    %cst_5 = arith.constant dense<0.000000e+00> : vector<256x128xf32>
    %5 = tpu.matmul %3, %4, %cst_5 {dimension_numbers = #tpu.dot_dimension_numbers<[1], [0], [0], [1], [0, 0, 1, 1], [], []>} : vector<256x256xbf16>, vector<256x128xbf16>, vector<256x128xf32> -> vector<256x128xf32>
    %c0_6 = arith.constant 0 : index
    %c0_7 = arith.constant 0 : index
    %6 = vector.load %arg3[%c0_6, %c0_7] : memref<1x128xf32, #tpu.memory_space<vmem>>, vector<1x128xf32>
    %7 = vector.broadcast %6 : vector<1x128xf32> to vector<256x128xf32>
    %8 = arith.addf %5, %7 : vector<256x128xf32>
    %cst_8 = arith.constant 0.000000e+00 : f32
    %9 = vector.broadcast %cst_8 : f32 to vector<256x128xf32>
    %10 = arith.maximumf %8, %9 : vector<256x128xf32>
    %11 = arith.truncf %10 : vector<256x128xf32> to vector<256x128xbf16>
    %c0_9 = arith.constant 0 : index
    %c0_10 = arith.constant 0 : index
    %12 = vector.load %arg4[%c0_9, %c0_10] : memref<128x128xbf16, #tpu.memory_space<vmem>>, vector<128x128xbf16>
    %cst_11 = arith.constant dense<0.000000e+00> : vector<256x128xf32>
    %13 = tpu.matmul %11, %12, %cst_11 {dimension_numbers = #tpu.dot_dimension_numbers<[1], [0], [0], [1], [0, 0, 1, 1], [], []>} : vector<256x128xbf16>, vector<128x128xbf16>, vector<256x128xf32> -> vector<256x128xf32>
    %14 = arith.truncf %13 : vector<256x128xf32> to vector<256x128xbf16>
    %c0_12 = arith.constant 0 : index
    %c0_13 = arith.constant 0 : index
    %15 = vector.load %arg0[%c0_12, %c0_13] : memref<256x256xbf16, #tpu.memory_space<vmem>>, vector<256x256xbf16>
    %cst_14 = arith.constant dense<0.000000e+00> : vector<256x128xf32>
    %16 = tpu.matmul %15, %14, %cst_14 {dimension_numbers = #tpu.dot_dimension_numbers<[1], [0], [0], [1], [0, 0, 1, 1], [], []>} : vector<256x256xbf16>, vector<256x128xbf16>, vector<256x128xf32> -> vector<256x128xf32>
    %c0_15 = arith.constant 0 : index
    %c0_16 = arith.constant 0 : index
    %17 = vector.load %arg5[%c0_15, %c0_16] : memref<1x128xf32, #tpu.memory_space<vmem>>, vector<1x128xf32>
    %18 = vector.broadcast %17 : vector<1x128xf32> to vector<256x128xf32>
    %19 = arith.addf %16, %18 : vector<256x128xf32>
    %c0_17 = arith.constant 0 : index
    %c0_18 = arith.constant 0 : index
    %20 = vector.load %arg6[%c0_17, %c0_18] : memref<256x128xf32, #tpu.memory_space<vmem>>, vector<256x128xf32>
    tpu.vector_store %arg6[%c0_17, %c0_18], %19 {strides = array<i32>} : memref<256x128xf32, #tpu.memory_space<vmem>>, vector<256x128xf32>,
    return
  }
}

</mosaic_0001>

<bundles_post_ra>
// kernel: tpu_custom_call.1
= control target key start
LH: loop header
LB: loop body
LE: loop exit
PB: predicated region body
PF: predicated region fallthrough
CT: control target
= control target key end

     0   :  { %11 = vsyncpa [#allocation3], 0  ;;  %s2045_s0 = inlined_call_operand.hbm [shape: bf16[256,256], index: 0, kind: input, shape index: {}]   ;;  %s2046_s1 = inlined_call_operand.hbm [shape: bf16[256,128], index: 1, kind: input, shape index: {}]   ;;  %s2047_s2 = inlined_call_operand.hbm [shape: bf16[128,128], index: 2, kind: input, shape index: {}]   ;;  %s2048_s3 = inlined_call_operand.vmem [shape: f32[1,128], index: 3, kind: input, shape index: {}]   ;;  %s2049_s4 = inlined_call_operand.hbm [shape: bf16[128,128], index: 4, kind: input, shape index: {}]   ;;  %s2050_s5 = inlined_call_operand.vmem [shape: f32[1,128], index: 5, kind: input, shape index: {}]   ;;  %s2051_s6 = inlined_call_operand.hbm [shape: f32[256,128], index: 6, kind: output, shape index: {}]  }
   0x1   :  { %12 = vsyncpa [#allocation6], 0 }
   0x2   :  { %13 = vsyncpa [#allocation9], 0  ;;  %s32_s23 = sshll.u32 %s2046_s1, 4  ;;  %s33_s23 = int_to_ptr.hbm [resolvable:$true] %s32_s23 }
   0x3   :  { %14 = vsyncpa [#allocation4], 0  ;;  %s1685_s24 = smov [#allocation5]   ;;  %s19_s28 = sshll.u32 %s2045_s0, 4  ;;  %s20_s28 = int_to_ptr.hbm [resolvable:$true] %s19_s28 }
   0x4   :  { %s34_s25 = sshll.u32 %s1685_s24, 4  ;;  %s1686_s29 = smov 64   ;;  %s35_s25 = int_to_ptr.vmem [resolvable:$true] %s34_s25 }
   0x5   :  { %s1687_s30 = smov 4   ;;  %s1688_s7 = smov [#allocation2]  }
   0x6   :  { %40 = dma.hbm_to_vmem [thread:$0]  %s33_s23, 2048, %s35_s25, [#allocation6], %s1686_s29, %s1686_s29, %s1687_s30  }
   0x7   :  { %s21_s8 = sshll.u32 %s1688_s7, 4  ;;  %s1689_s9 = smov 128   ;;  %s22_s8 = int_to_ptr.vmem [resolvable:$true] %s21_s8 }
   0x8   :  { %s1690_s10 = smov 8   ;;  %s45_s12 = sshll.u32 %s2047_s2, 4  ;;  %s46_s12 = int_to_ptr.hbm [resolvable:$true] %s45_s12 }
   0x9   :  { %27 = dma.hbm_to_vmem [thread:$0]  %s20_s28, 4096, %s22_s8, [#allocation3], %s1689_s9, %s1689_s9, %s1690_s10  }
   0xa   :  { %s1691_s13 = smov [#allocation7]   ;;  %s60_s16 = sshll.u32 %s2049_s4, 4  ;;  %s61_s16 = int_to_ptr.hbm [resolvable:$true] %s60_s16 }
   0xb   :  { %s47_s0 = sshll.u32 %s1691_s13, 4  ;;  %s1692_s17 = smov [#allocation8]   ;;  %s48_s0 = int_to_ptr.vmem [resolvable:$true] %s47_s0 }
   0xc   :  { %53 = dma.hbm_to_vmem [thread:$0]  %s46_s12, 1024, %s48_s0, [#allocation6], %s1686_s29, %s1686_s29, %s1687_s30  }
   0xd   :  { %s62_s18 = sshll.u32 %s1692_s17, 4  ;;  %s63_s18 = int_to_ptr.vmem [resolvable:$true] %s62_s18 }
   0xe   :  { %68 = dma.hbm_to_vmem [thread:$0]  %s61_s16, 1024, %s63_s18, [#allocation9], %s1686_s29, %s1686_s29, %s1687_s30  }
   0xf   :  { %1677 = dma.done.wait [#allocation3], 4096  }
  0x10   :  { %1678 = vsyncadd [#allocation3], 4294963200 }
  0x11   :  { %1679 = dma.done.wait [#allocation6], 3072  }
  0x12   :  { %1680 = vsyncadd [#allocation6], 4294964224 }
  0x13   :  { %1681 = dma.done.wait [#allocation9], 1024  }
  0x14   :  { %1682 = vsyncadd [#allocation9], 4294966272  ;;  %v1489_v0 = vld [vmem:[#allocation7 + $0x38] sm:$0xff]  ;;  %v1488_v1 = vld [vmem:[#allocation7 + $0x30] sm:$0xff]  ;;  %s1195_s23 = sshll.u32 %s2051_s6, 4  ;;  %s1196_s23 = int_to_ptr.hbm [resolvable:$true] %s1195_s23 }
  0x15   :  { %279 = vmatpush.bf16.msra.mxu0 %v1489_v0  ;;  %1530 = vmatpush.bf16.msra.mxu2 %v1489_v0  ;;  %v1487_v2 = vld [vmem:[#allocation7 + $0x28] sm:$0xff]  ;;  %v1486_v3 = vld [vmem:[#allocation7 + $0x20] sm:$0xff]  ;;  %v1485_v4 = vld [vmem:[#allocation7 + $0x18] sm:$0xff] }
  0x16   :  { %v1484_v5 = vld [vmem:[#allocation7 + $0x10] sm:$0xff]  ;;  %v1483_v6 = vld [vmem:[#allocation7 + $0x8] sm:$0xff]  ;;  %v1482_v7 = vld [vmem:[#allocation7] sm:$0xff] }
  0x17   :  { %v1466_v8 = vld [vmem:[#allocation5] sm:$0xff]  ;;  %v1467_v10 = vld [vmem:[#allocation5 + $0x8] sm:$0xff]  ;;  %v1468_v12 = vld [vmem:[#allocation5 + $0x10] sm:$0xff] }
  0x18   :  { %v1474_v9 = vld [vmem:[#allocation5 + $0x40] sm:$0xff]  ;;  %v1475_v11 = vld [vmem:[#allocation5 + $0x48] sm:$0xff]  ;;  %v1476_v13 = vld [vmem:[#allocation5 + $0x50] sm:$0xff] }
  0x19   :  { %280 = vmatpush.bf16.msra.mxu0 %v1488_v1  ;;  %1531 = vmatpush.bf16.msra.mxu2 %v1488_v1  ;;  %v1469_v14 = vld [vmem:[#allocation5 + $0x18] sm:$0xff]  ;;  %v1470_v16 = vld [vmem:[#allocation5 + $0x20] sm:$0xff]  ;;  %v1471_v18 = vld [vmem:[#allocation5 + $0x28] sm:$0xff] }
  0x1a   :  { %v1477_v15 = vld [vmem:[#allocation5 + $0x58] sm:$0xff]  ;;  %v1478_v17 = vld [vmem:[#allocation5 + $0x60] sm:$0xff]  ;;  %v1479_v19 = vld [vmem:[#allocation5 + $0x68] sm:$0xff] }
  0x1b   :  { %v1472_v20 = vld [vmem:[#allocation5 + $0x30] sm:$0xff]  ;;  %v1473_v22 = vld [vmem:[#allocation5 + $0x38] sm:$0xff] }
  0x1c   :  { %v1480_v21 = vld [vmem:[#allocation5 + $0x70] sm:$0xff]  ;;  %v1481_v23 = vld [vmem:[#allocation5 + $0x78] sm:$0xff] }
  0x1d   :  { %281 = vmatpush.bf16.msra.mxu0 %v1487_v2  ;;  %1532 = vmatpush.bf16.msra.mxu2 %v1487_v2 }
  0x21   :  { %282 = vmatpush.bf16.msra.mxu0 %v1486_v3  ;;  %1533 = vmatpush.bf16.msra.mxu2 %v1486_v3 }
  0x25   :  { %283 = vmatpush.bf16.msra.mxu0 %v1485_v4  ;;  %1534 = vmatpush.bf16.msra.mxu2 %v1485_v4  ;;  %v1308_v4 = vld [vmem:[#allocation2] sm:$0xf] }
  0x29   :  { %284 = vmatpush.bf16.msra.mxu0 %v1484_v5  ;;  %1535 = vmatpush.bf16.msra.mxu2 %v1484_v5 }
  0x2d   :  { %285 = vmatpush.bf16.msra.mxu0 %v1483_v6  ;;  %1536 = vmatpush.bf16.msra.mxu2 %v1483_v6  ;;  %v1491_v6 = vld [vmem:[#allocation2 + $0x4] sm:$0xf0] }
  0x31   :  { %286 = vmatpush.bf16.msra.mxu0 %v1482_v7  ;;  %1537 = vmatpush.bf16.msra.mxu2 %v1482_v7  ;;  %v1372_v7 = vld [vmem:[#allocation2 + $0x80] sm:$0xf] }
  0x34   :  { %287 = vmatmul.bf16.vlgmr.msra.gmra.mxu0 %v1466_v8  ;;  %327 = vmatmul.bf16.vlgmr.msra.gmra.mxu2 %v1474_v9  ;;  %v1507_v8 = vld [vmem:[#allocation2 + $0x84] sm:$0xf0] }
  0x44   :  { %292 = vmatmul.bf16.gmra.mxu0 %v1467_v10  ;;  %332 = vmatmul.bf16.gmra.mxu2 %v1475_v11  ;;  %v1758_v10 = vor.u32 %v1491_v6, %v1308_v4  ;;  %v1760_v11 = vor.u32 %v1507_v8, %v1372_v7  ;;  %v1527_v6 = vld [vmem:[#allocation8 + $0x28] sm:$0xff]  ;;  %v1502_v7 = vld [vmem:[#allocation2 + $0x64] sm:$0xf] }
  0x45   :  { %v1358_v8 = vld [vmem:[#allocation2 + $0x68] sm:$0xf0] }
  0x54   :  { %297 = vmatmul.bf16.gmra.mxu0 %v1468_v12  ;;  %337 = vmatmul.bf16.gmra.mxu2 %v1476_v13  ;;  %v1490_v13 = vld [vmem:[#allocation2 + $0x4] sm:$0xf] }
  0x64   :  { %302 = vmatmul.bf16.gmra.mxu0 %v1469_v14  ;;  %342 = vmatmul.bf16.gmra.mxu2 %v1477_v15  ;;  %v1310_v14 = vld [vmem:[#allocation2 + $0x8] sm:$0xf0] }
  0x74   :  { %307 = vmatmul.bf16.gmra.mxu0 %v1470_v16  ;;  %347 = vmatmul.bf16.gmra.mxu2 %v1478_v17  ;;  %v1768_v16 = vor.u32 %v1490_v13, %v1310_v14  ;;  %v1316_v17 = vld [vmem:[#allocation2 + $0x10] sm:$0xf]  ;;  %v1525_v13 = vld [vmem:[#allocation8 + $0x18] sm:$0xff] }
  0x75   :  { %v1364_v14 = vld [vmem:[#allocation2 + $0x70] sm:$0xf] }
  0x84   :  { %312 = vmatmul.bf16.gmra.mxu0 %v1471_v18  ;;  %352 = vmatmul.bf16.gmra.mxu2 %v1479_v19  ;;  %v1493_v18 = vld [vmem:[#allocation2 + $0x14] sm:$0xf0]  ;;  %v1380_v19 = vld [vmem:[#allocation2 + $0x90] sm:$0xf] }
  0x94   :  { %317 = vmatmul.bf16.gmra.mxu0 %v1472_v20  ;;  %357 = vmatmul.bf16.gmra.mxu2 %v1480_v21  ;;  %v1509_v20 = vld [vmem:[#allocation2 + $0x94] sm:$0xf0]  ;;  %v1771_v21 = vor.u32 %v1493_v18, %v1316_v17  ;;  %v1428_v17 = vld [vmem:[#allocation2 + $0xf0] sm:$0xf] }
  0x95   :  { %v1521_v18 = vld [vmem:[#allocation2 + $0xf4] sm:$0xf0] }
  0xa4   :  { %322 = vmatmul.bf16.gmra.mxu0 %v1473_v22  ;;  %362 = vmatmul.bf16.gmra.mxu2 %v1481_v23  ;;  %v1773_v22 = vor.u32 %v1509_v20, %v1380_v19  ;;  %v1492_v23 = vld [vmem:[#allocation2 + $0x14] sm:$0xf] }
  0xa5   :  { %v1524_v19 = vld [vmem:[#allocation8 + $0x10] sm:$0xff] }
  0xb1   :  { %v1744_v24 = vpop.f32.mrf.mxu0 }
  0xb7   :  { %v1746_v25 = vpop.f32.mrf.mxu2 }
  0xb9   :  { %v1748_v26 = vpop.f32.mrf.mxu0 }
  0xba   :  { %v400_v9 = vpack.c.bf16 %v1748_v26, %v1744_v24  ;;  %v1318_v24 = vld [vmem:[#allocation2 + $0x18] sm:$0xf0]  ;;  %v1324_v26 = vld [vmem:[#allocation2 + $0x20] sm:$0xf] }
  0xbf   :  { %v1750_v27 = vpop.f32.mrf.mxu2 }
  0xc0   :  { %v408_v15 = vpack.c.bf16 %v1750_v27, %v1746_v25  ;;  %v1777_v25 = vor.u32 %v1492_v23, %v1318_v24  ;;  %v1495_v27 = vld [vmem:[#allocation2 + $0x24] sm:$0xf0]  ;;  %v1827_v23 = vor.u32 %v1521_v18, %v1428_v17  ;;  %v1504_v24 = vld [vmem:[#allocation2 + $0x74] sm:$0xf] }
  0xc1   :  { %v293_v28 = vpop.f32.mrf.mxu0 }
  0xc7   :  { %v1752_v29 = vpop.f32.mrf.mxu2 }
  0xc9   :  { %v295_v30 = vpop.f32.mrf.mxu0 }
  0xca   :  { %v401_v3 = vpack.c.bf16 %v295_v30, %v293_v28  ;;  %v1388_v28 = vld [vmem:[#allocation2 + $0xa0] sm:$0xf]  ;;  %v1780_v30 = vor.u32 %v1495_v27, %v1324_v26  ;;  %v1366_v26 = vld [vmem:[#allocation2 + $0x78] sm:$0xf0]  ;;  %v1523_v27 = vld [vmem:[#allocation8 + $0x8] sm:$0xff] }
  0xcf   :  { %v1754_v31 = vpop.f32.mrf.mxu2 }
  0xd0   :  { %v409_v12 = vpack.c.bf16 %v1754_v31, %v1752_v29  ;;  %v1511_v29 = vld [vmem:[#allocation2 + $0xa4] sm:$0xf0] }
  0xd1   :  { %v298_v32 = vpop.f32.mrf.mxu0  ;;  %v1782_v31 = vor.u32 %v1511_v29, %v1388_v28  ;;  %v1831_v28 = vor.u32 %v1504_v24, %v1366_v26  ;;  %v1522_v29 = vld [vmem:[#allocation8] sm:$0xff] }
  0xd7   :  { %v338_v33 = vpop.f32.mrf.mxu2 }
  0xd9   :  { %v300_v34 = vpop.f32.mrf.mxu0 }
  0xda   :  { %v402_v1 = vpack.c.bf16 %v300_v34, %v298_v32  ;;  %v1494_v32 = vld [vmem:[#allocation2 + $0x24] sm:$0xf] }
  0xdf   :  { %v340_v35 = vpop.f32.mrf.mxu2 }
  0xe0   :  { %v410_v5 = vpack.c.bf16 %v340_v35, %v338_v33  ;;  %v1326_v33 = vld [vmem:[#allocation2 + $0x28] sm:$0xf0]  ;;  %v1332_v35 = vld [vmem:[#allocation2 + $0x30] sm:$0xf] }
  0xe1   :  { %v303_v36 = vpop.f32.mrf.mxu0  ;;  %v1786_v34 = vor.u32 %v1494_v32, %v1326_v33  ;;  %v1506_v33 = vld [vmem:[#allocation2 + $0x84] sm:$0xf] }
  0xe7   :  { %v343_v37 = vpop.f32.mrf.mxu2 }
  0xe9   :  { %v305_v38 = vpop.f32.mrf.mxu0 }
  0xea   :  { %v403_v63 = vpack.c.bf16 %v305_v38, %v303_v36  ;;  %v1497_v36 = vld [vmem:[#allocation2 + $0x34] sm:$0xf0] }
  0xeb   :  { %v1513_v38 = vld [vmem:[#allocation2 + $0xb4] sm:$0xf0] }
  0xef   :  { %v345_v39 = vpop.f32.mrf.mxu2 }
  0xf0   :  { %v411_v2 = vpack.c.bf16 %v345_v39, %v343_v37  ;;  %v1396_v37 = vld [vmem:[#allocation2 + $0xb0] sm:$0xf]  ;;  %v1789_v39 = vor.u32 %v1497_v36, %v1332_v35  ;;  %v1374_v35 = vld [vmem:[#allocation2 + $0x88] sm:$0xf0] }
  0xf1   :  { %v308_v40 = vpop.f32.mrf.mxu0  ;;  %v1834_v36 = vor.u32 %v1506_v33, %v1374_v35  ;;  %v1512_v35 = vld [vmem:[#allocation2 + $0xb4] sm:$0xf] }
  0xf7   :  { %v348_v41 = vpop.f32.mrf.mxu2 }
  0xf9   :  { %v310_v42 = vpop.f32.mrf.mxu0 }
  0xfa   :  { %v404_v61 = vpack.c.bf16 %v310_v42, %v308_v40  ;;  %v1791_v40 = vor.u32 %v1513_v38, %v1396_v37  ;;  %v1334_v42 = vld [vmem:[#allocation2 + $0x38] sm:$0xf0] }
  0xff   :  { %v350_v43 = vpop.f32.mrf.mxu2 }
 0x100   :  { %v412_v0 = vpack.c.bf16 %v350_v43, %v348_v41  ;;  %v1496_v41 = vld [vmem:[#allocation2 + $0x34] sm:$0xf] }
 0x101   :  { %v313_v44 = vpop.f32.mrf.mxu0  ;;  %v1795_v43 = vor.u32 %v1496_v41, %v1334_v42  ;;  %v1842_v41 = vld [vmem:[%s2048_s3] ss:$0 sm:$0xff] }
 0x107   :  { %v353_v45 = vpop.f32.mrf.mxu2 }
 0x109   :  { %v315_v46 = vpop.f32.mrf.mxu0 }
 0x10a   :  { %v405_v59 = vpack.c.bf16 %v315_v46, %v313_v44  ;;  %v1340_v44 = vld [vmem:[#allocation2 + $0x40] sm:$0xf] }
 0x10b   :  { %v1404_v46 = vld [vmem:[#allocation2 + $0xc0] sm:$0xf] }
 0x10f   :  { %v355_v47 = vpop.f32.mrf.mxu2 }
 0x110   :  { %v413_v62 = vpack.c.bf16 %v355_v47, %v353_v45  ;;  %v1499_v45 = vld [vmem:[#allocation2 + $0x44] sm:$0xf0] }
 0x111   :  { %v318_v48 = vpop.f32.mrf.mxu0  ;;  %v1515_v47 = vld [vmem:[#allocation2 + $0xc4] sm:$0xf0] }
 0x117   :  { %v358_v49 = vpop.f32.mrf.mxu2 }
 0x119   :  { %v320_v50 = vpop.f32.mrf.mxu0 }
 0x11a   :  { %v406_v56 = vpack.c.bf16 %v320_v50, %v318_v48  ;;  %v1798_v48 = vor.u32 %v1499_v45, %v1340_v44  ;;  %v1498_v50 = vld [vmem:[#allocation2 + $0x44] sm:$0xf] }
 0x11f   :  { %v360_v51 = vpop.f32.mrf.mxu2 }
 0x120   :  { %v414_v60 = vpack.c.bf16 %v360_v51, %v358_v49  ;;  %v1800_v49 = vor.u32 %v1515_v47, %v1404_v46  ;;  %v1342_v51 = vld [vmem:[#allocation2 + $0x48] sm:$0xf0]  ;;  %v1508_v47 = vld [vmem:[#allocation2 + $0x94] sm:$0xf] }
 0x121   :  { %v323_v52 = vpop.f32.mrf.mxu0 }
 0x127   :  { %v363_v53 = vpop.f32.mrf.mxu2 }
 0x129   :  { %v325_v54 = vpop.f32.mrf.mxu0 }
 0x12a   :  { %v407_v55 = vpack.c.bf16 %v325_v54, %v323_v52  ;;  %v1804_v52 = vor.u32 %v1498_v50, %v1342_v51  ;;  %v1501_v54 = vld [vmem:[#allocation2 + $0x54] sm:$0xf0]  ;;  %v1382_v50 = vld [vmem:[#allocation2 + $0x98] sm:$0xf0] }
 0x12c   :  { %580 = vmatpush.bf16.msra.mxu1 %v407_v55  ;;  %1538 = vmatpush.bf16.msra.mxu3 %v407_v55  ;;  %v1412_v55 = vld [vmem:[#allocation2 + $0xd0] sm:$0xf] }
 0x12f   :  { %v365_v57 = vpop.f32.mrf.mxu2 }
 0x130   :  { %581 = vmatpush.bf16.msra.mxu1 %v406_v56  ;;  %1539 = vmatpush.bf16.msra.mxu3 %v406_v56  ;;  %v415_v58 = vpack.c.bf16 %v365_v57, %v363_v53  ;;  %v1348_v53 = vld [vmem:[#allocation2 + $0x50] sm:$0xf]  ;;  %v1517_v56 = vld [vmem:[#allocation2 + $0xd4] sm:$0xf0] }
 0x131   :  { %v1807_v57 = vor.u32 %v1501_v54, %v1348_v53 }
 0x132   :  { %669 = vmatpush.bf16.msrb.mxu2 %v415_v58  ;;  %v1809_v58 = vor.u32 %v1517_v56, %v1412_v55  ;;  %v1848_v56 = vor.u32 %v1508_v47, %v1382_v50 }
 0x134   :  { %582 = vmatpush.bf16.msra.mxu1 %v405_v59  ;;  %1540 = vmatpush.bf16.msra.mxu3 %v405_v59  ;;  %v1500_v59 = vld [vmem:[#allocation2 + $0x54] sm:$0xf] }
 0x136   :  { %670 = vmatpush.bf16.msrb.mxu2 %v414_v60  ;;  %v1350_v60 = vld [vmem:[#allocation2 + $0x58] sm:$0xf0] }
 0x138   :  { %583 = vmatpush.bf16.msra.mxu1 %v404_v61  ;;  %1541 = vmatpush.bf16.msra.mxu3 %v404_v61  ;;  %v1813_v61 = vor.u32 %v1500_v59, %v1350_v60 }
 0x13a   :  { %671 = vmatpush.bf16.msrb.mxu2 %v413_v62  ;;  %v1529_v62 = vld [vmem:[#allocation8 + $0x38] sm:$0xff] }
 0x13c   :  { %584 = vmatpush.bf16.msra.mxu1 %v403_v63  ;;  %1542 = vmatpush.bf16.msra.mxu3 %v403_v63  ;;  %v1356_v63 = vld [vmem:[#allocation2 + $0x60] sm:$0xf] }
 0x13e   :  { %672 = vmatpush.bf16.msrb.mxu2 %v412_v0  ;;  %v1528_v0 = vld [vmem:[#allocation8 + $0x30] sm:$0xff] }
 0x140   :  { %585 = vmatpush.bf16.msra.mxu1 %v402_v1  ;;  %1543 = vmatpush.bf16.msra.mxu3 %v402_v1  ;;  %v1503_v1 = vld [vmem:[#allocation2 + $0x64] sm:$0xf0] }
 0x141   :  { %v1816_v4 = vor.u32 %v1503_v1, %v1356_v63 }
 0x142   :  { %673 = vmatpush.bf16.msrb.mxu2 %v411_v2  ;;  %v1420_v2 = vld [vmem:[#allocation2 + $0xe0] sm:$0xf] }
 0x144   :  { %586 = vmatpush.bf16.msra.mxu1 %v401_v3  ;;  %1544 = vmatpush.bf16.msra.mxu3 %v401_v3  ;;  %v1519_v3 = vld [vmem:[#allocation2 + $0xe4] sm:$0xf0] }
 0x146   :  { %674 = vmatpush.bf16.msrb.mxu2 %v410_v5  ;;  %v1818_v5 = vor.u32 %v1519_v3, %v1420_v2 }
 0x148   :  { %587 = vmatpush.bf16.msra.mxu1 %v400_v9  ;;  %1545 = vmatpush.bf16.msra.mxu3 %v400_v9  ;;  %v1526_v9 = vld [vmem:[#allocation8 + $0x20] sm:$0xff] }
 0x14a   :  { %675 = vmatpush.bf16.msrb.mxu2 %v409_v12  ;;  %v1822_v12 = vor.u32 %v1502_v7, %v1358_v8  ;;  %v1510_v7 = vld [vmem:[#allocation2 + $0xa4] sm:$0xf]  ;;  %v1390_v8 = vld [vmem:[#allocation2 + $0xa8] sm:$0xf0] }
 0x14b   :  { %588 = vmatmul.bf16.vlgmr.msra.gmra.mxu1 %v1758_v10  ;;  %628 = vmatmul.bf16.vlgmr.msra.gmra.mxu3 %v1760_v11  ;;  %v1857_v17 = vor.u32 %v1510_v7, %v1390_v8 }
 0x14c   :  { %870 = vmatpush.bf16.msrb.mxu3 %v1529_v62 }
 0x14e   :  { %676 = vmatpush.bf16.msrb.mxu2 %v408_v15  ;;  %v1505_v15 = vld [vmem:[#allocation2 + $0x74] sm:$0xf0] }
 0x14f   :  { %v1825_v20 = vor.u32 %v1505_v15, %v1364_v14 }
 0x150   :  { %871 = vmatpush.bf16.msrb.mxu3 %v1528_v0 }
 0x151   :  { %677 = vmatmul.bf16.vlgmr.msrb.gmra.mxu2 %v1768_v16 }
 0x154   :  { %872 = vmatpush.bf16.msrb.mxu3 %v1527_v6 }
 0x158   :  { %873 = vmatpush.bf16.msrb.mxu3 %v1526_v9 }
 0x15b   :  { %593 = vmatmul.bf16.gmra.mxu1 %v1771_v21  ;;  %633 = vmatmul.bf16.gmra.mxu3 %v1773_v22 }
 0x15c   :  { %874 = vmatpush.bf16.msrb.mxu3 %v1525_v13 }
 0x160   :  { %875 = vmatpush.bf16.msrb.mxu3 %v1524_v19 }
 0x161   :  { %682 = vmatmul.bf16.gmra.mxu2 %v1777_v25 }
 0x164   :  { %876 = vmatpush.bf16.msrb.mxu3 %v1523_v27 }
 0x168   :  { %877 = vmatpush.bf16.msrb.mxu3 %v1522_v29 }
 0x16b   :  { %598 = vmatmul.bf16.gmra.mxu1 %v1780_v30  ;;  %638 = vmatmul.bf16.gmra.mxu3 %v1782_v31 }
 0x171   :  { %687 = vmatmul.bf16.gmra.mxu2 %v1786_v34 }
 0x17b   :  { %603 = vmatmul.bf16.gmra.mxu1 %v1789_v39  ;;  %643 = vmatmul.bf16.gmra.mxu3 %v1791_v40 }
 0x181   :  { %692 = vmatmul.bf16.gmra.mxu2 %v1795_v43 }
 0x18b   :  { %608 = vmatmul.bf16.gmra.mxu1 %v1798_v48  ;;  %648 = vmatmul.bf16.gmra.mxu3 %v1800_v49 }
 0x191   :  { %697 = vmatmul.bf16.gmra.mxu2 %v1804_v52 }
 0x19b   :  { %613 = vmatmul.bf16.gmra.mxu1 %v1807_v57  ;;  %653 = vmatmul.bf16.gmra.mxu3 %v1809_v58 }
 0x1a1   :  { %702 = vmatmul.bf16.gmra.mxu2 %v1813_v61 }
 0x1ab   :  { %618 = vmatmul.bf16.gmra.mxu1 %v1816_v4  ;;  %658 = vmatmul.bf16.gmra.mxu3 %v1818_v5 }
 0x1b1   :  { %707 = vmatmul.bf16.gmra.mxu2 %v1822_v12 }
 0x1bb   :  { %623 = vmatmul.bf16.gmra.mxu1 %v1825_v20  ;;  %663 = vmatmul.bf16.gmra.mxu3 %v1827_v23 }
 0x1c1   :  { %712 = vmatmul.bf16.gmra.mxu2 %v1831_v28 }
 0x1c8   :  { %v589_v32 = vpop.f32.mrf.mxu1 }
 0x1c9   :  { %v590_v45 = vadd.f32 %v1842_v41, %v589_v32 }
 0x1ce   :  { %v1836_v37 = vpop.f32.mrf.mxu3 }
 0x1d0   :  { %v591_v38 = vpop.f32.mrf.mxu1 }
 0x1d1   :  { %717 = vmatmul.bf16.gmra.mxu2 %v1834_v36  ;;  %v592_v51 = vadd.f32 %v1842_v41, %v591_v38  ;;  %v1398_v38 = vld [vmem:[#allocation2 + $0xb8] sm:$0xf0] }
 0x1d4   :  { %v678_v42 = vpop.f32.mrf.mxu2 }
 0x1d5   :  { %v679_v53 = vadd.f32 %v678_v42, %v590_v45 }
 0x1d6   :  { %v1844_v44 = vpop.f32.mrf.mxu3 }
 0x1d7   :  { %v758_v60 = vmax.f32 %v679_v53, 0.0 }
 0x1d8   :  { %v594_v46 = vpop.f32.mrf.mxu1 }
 0x1d9   :  { %v595_v3 = vadd.f32 %v1842_v41, %v594_v46 }
 0x1dc   :  { %v680_v54 = vpop.f32.mrf.mxu2 }
 0x1dd   :  { %v681_v55 = vadd.f32 %v680_v54, %v592_v51  ;;  %v1866_v51 = vor.u32 %v1512_v35, %v1398_v38  ;;  %v1516_v38 = vld [vmem:[#allocation2 + $0xd4] sm:$0xf] }
 0x1de   :  { %v1850_v59 = vpop.f32.mrf.mxu3 }
 0x1df   :  { %v759_v62 = vmax.f32 %v681_v55, 0.0 }
 0x1e0   :  { %v596_v63 = vpop.f32.mrf.mxu1 }
 0x1e1   :  { %722 = vmatmul.bf16.gmra.mxu2 %v1848_v56  ;;  %v790_v0 = vpack.c.bf16 %v759_v62, %v758_v60  ;;  %v597_v9 = vadd.f32 %v1842_v41, %v596_v63 }
 0x1e3   :  { %878 = vmatmul.bf16.vlgmr.msrb.gmra.mxu3 %v790_v0 }
 0x1e4   :  { %v683_v1 = vpop.f32.mrf.mxu2 }
 0x1e5   :  { %v684_v13 = vadd.f32 %v683_v1, %v595_v3  ;;  %v1514_v3 = vld [vmem:[#allocation2 + $0xc4] sm:$0xf] }
 0x1e6   :  { %v1853_v2 = vpop.f32.mrf.mxu3 }
 0x1e7   :  { %v760_v18 = vmax.f32 %v684_v13, 0.0 }
 0x1e8   :  { %v599_v6 = vpop.f32.mrf.mxu1 }
 0x1e9   :  { %v600_v32 = vadd.f32 %v1842_v41, %v599_v6  ;;  %v1406_v6 = vld [vmem:[#allocation2 + $0xc8] sm:$0xf0] }
 0x1ec   :  { %v685_v14 = vpop.f32.mrf.mxu2 }
 0x1ed   :  { %v686_v15 = vadd.f32 %v685_v14, %v597_v9  ;;  %v1873_v14 = vor.u32 %v1514_v3, %v1406_v6 }
 0x1ee   :  { %v1859_v26 = vpop.f32.mrf.mxu3 }
 0x1ef   :  { %v761_v19 = vmax.f32 %v686_v15, 0.0 }
 0x1f0   :  { %v601_v24 = vpop.f32.mrf.mxu1 }
 0x1f1   :  { %727 = vmatmul.bf16.gmra.mxu2 %v1857_v17  ;;  %v791_v27 = vpack.c.bf16 %v761_v19, %v760_v18  ;;  %v602_v45 = vadd.f32 %v1842_v41, %v601_v24 }
 0x1f3   :  { %883 = vmatmul.bf16.gmra.mxu3 %v791_v27 }
 0x1f4   :  { %v688_v29 = vpop.f32.mrf.mxu2 }
 0x1f5   :  { %v689_v46 = vadd.f32 %v688_v29, %v600_v32 }
 0x1f6   :  { %v1863_v42 = vpop.f32.mrf.mxu3 }
 0x1f7   :  { %v762_v53 = vmax.f32 %v689_v46, 0.0 }
 0x1f8   :  { %v604_v33 = vpop.f32.mrf.mxu1 }
 0x1f9   :  { %v605_v0 = vadd.f32 %v1842_v41, %v604_v33 }
 0x1fc   :  { %v690_v47 = vpop.f32.mrf.mxu2 }
 0x1fd   :  { %v691_v50 = vadd.f32 %v690_v47, %v602_v45  ;;  %v1414_v45 = vld [vmem:[#allocation2 + $0xd8] sm:$0xf0] }
 0x1fe   :  { %v1869_v63 = vpop.f32.mrf.mxu3 }
 0x1ff   :  { %v763_v54 = vmax.f32 %v691_v50, 0.0 }
 0x200   :  { %v606_v55 = vpop.f32.mrf.mxu1 }
 0x201   :  { %732 = vmatmul.bf16.gmra.mxu2 %v1866_v51  ;;  %v792_v60 = vpack.c.bf16 %v763_v54, %v762_v53  ;;  %v607_v7 = vadd.f32 %v1842_v41, %v606_v55  ;;  %v1882_v54 = vor.u32 %v1516_v38, %v1414_v45 }
 0x203   :  { %888 = vmatmul.bf16.gmra.mxu3 %v792_v60 }
 0x204   :  { %v693_v62 = vpop.f32.mrf.mxu2 }
 0x205   :  { %v694_v8 = vadd.f32 %v693_v62, %v605_v0 }
 0x206   :  { %v1875_v15 = vpop.f32.mrf.mxu3 }
 0x207   :  { %v764_v18 = vmax.f32 %v694_v8, 0.0  ;;  %v1518_v8 = vld [vmem:[#allocation2 + $0xe4] sm:$0xf] }
 0x208   :  { %v609_v1 = vpop.f32.mrf.mxu1 }
 0x209   :  { %v610_v32 = vadd.f32 %v1842_v41, %v609_v1 }
 0x20c   :  { %v695_v9 = vpop.f32.mrf.mxu2 }
 0x20d   :  { %v696_v13 = vadd.f32 %v695_v9, %v607_v7  ;;  %v1422_v9 = vld [vmem:[#allocation2 + $0xe8] sm:$0xf0] }
 0x20e   :  { %v1879_v35 = vpop.f32.mrf.mxu3 }
 0x20f   :  { %v765_v19 = vmax.f32 %v696_v13, 0.0 }
 0x210   :  { %v611_v24 = vpop.f32.mrf.mxu1 }
 0x211   :  { %737 = vmatmul.bf16.gmra.mxu2 %v1873_v14  ;;  %v793_v27 = vpack.c.bf16 %v765_v19, %v764_v18  ;;  %v612_v46 = vadd.f32 %v1842_v41, %v611_v24 }
 0x213   :  { %893 = vmatmul.bf16.gmra.mxu3 %v793_v27 }
 0x214   :  { %v698_v29 = vpop.f32.mrf.mxu2 }
 0x215   :  { %v699_v47 = vadd.f32 %v698_v29, %v610_v32  ;;  %v1891_v29 = vor.u32 %v1518_v8, %v1422_v9 }
 0x216   :  { %v1885_v3 = vpop.f32.mrf.mxu3 }
 0x217   :  { %v766_v55 = vmax.f32 %v699_v47, 0.0 }
 0x218   :  { %v614_v33 = vpop.f32.mrf.mxu1 }
 0x219   :  { %v615_v6 = vadd.f32 %v1842_v41, %v614_v33 }
 0x21c   :  { %v700_v50 = vpop.f32.mrf.mxu2 }
 0x21d   :  { %v701_v53 = vadd.f32 %v700_v50, %v612_v46 }
 0x21e   :  { %v1889_v24 = vpop.f32.mrf.mxu3 }
 0x21f   :  { %v767_v60 = vmax.f32 %v701_v53, 0.0  ;;  %v1520_v53 = vld [vmem:[#allocation2 + $0xf4] sm:$0xf] }
 0x220   :  { %v616_v62 = vpop.f32.mrf.mxu1 }
 0x221   :  { %v794_v0 = vpack.c.bf16 %v767_v60, %v766_v55  ;;  %742 = vmatmul.bf16.gmra.mxu2 %v1882_v54  ;;  %v617_v13 = vadd.f32 %v1842_v41, %v616_v62  ;;  %v1430_v55 = vld [vmem:[#allocation2 + $0xf8] sm:$0xf0] }
 0x223   :  { %898 = vmatmul.bf16.gmra.mxu3 %v794_v0 }
 0x224   :  { %v703_v1 = vpop.f32.mrf.mxu2 }
 0x225   :  { %v704_v18 = vadd.f32 %v703_v1, %v615_v6  ;;  %v1898_v6 = vor.u32 %v1520_v53, %v1430_v55 }
 0x226   :  { %v1894_v47 = vpop.f32.mrf.mxu3 }
 0x227   :  { %v768_v32 = vmax.f32 %v704_v18, 0.0 }
 0x228   :  { %v619_v7 = vpop.f32.mrf.mxu1 }
 0x229   :  { %v620_v50 = vadd.f32 %v1842_v41, %v619_v7 }
 0x22c   :  { %v705_v19 = vpop.f32.mrf.mxu2 }
 0x22d   :  { %v706_v27 = vadd.f32 %v705_v19, %v617_v13 }
 0x22e   :  { %v1900_v18 = vpop.f32.mrf.mxu3 }
 0x22f   :  { %v769_v38 = vmax.f32 %v706_v27, 0.0 }
 0x230   :  { %v621_v46 = vpop.f32.mrf.mxu1 }
 0x231   :  { %v795_v45 = vpack.c.bf16 %v769_v38, %v768_v32  ;;  %747 = vmatmul.bf16.gmra.mxu2 %v1891_v29  ;;  %v622_v60 = vadd.f32 %v1842_v41, %v621_v46 }
 0x233   :  { %903 = vmatmul.bf16.gmra.mxu3 %v795_v45 }
 0x234   :  { %v708_v33 = vpop.f32.mrf.mxu2 }
 0x235   :  { %v709_v62 = vadd.f32 %v708_v33, %v620_v50 }
 0x236   :  { %v1904_v38 = vpop.f32.mrf.mxu3 }
 0x237   :  { %v770_v9 = vmax.f32 %v709_v62, 0.0 }
 0x238   :  { %v624_v8 = vpop.f32.mrf.mxu1 }
 0x239   :  { %v625_v7 = vadd.f32 %v1842_v41, %v624_v8  ;;  %v632_v8 = vadd.f32 %v1842_v41, %v1844_v44 }
 0x23c   :  { %v710_v0 = vpop.f32.mrf.mxu2 }
 0x23d   :  { %v711_v1 = vadd.f32 %v710_v0, %v622_v60 }
 0x23e   :  { %v1907_v62 = vpop.f32.mrf.mxu3 }
 0x23f   :  { %v771_v13 = vmax.f32 %v711_v1, 0.0  ;;  %v630_v1 = vadd.f32 %v1842_v41, %v1836_v37  ;;  %v637_v37 = vadd.f32 %v1842_v41, %v1853_v2  ;;  %v642_v2 = vadd.f32 %v1842_v41, %v1863_v42 }
 0x240   :  { %v626_v32 = vpop.f32.mrf.mxu1  ;;  %v647_v42 = vadd.f32 %v1842_v41, %v1875_v15  ;;  %v652_v15 = vadd.f32 %v1842_v41, %v1885_v3 }
 0x241   :  { %v796_v19 = vpack.c.bf16 %v771_v13, %v770_v9  ;;  %752 = vmatmul.bf16.gmra.mxu2 %v1898_v6  ;;  %v627_v45 = vadd.f32 %v1842_v41, %v626_v32 }
 0x243   :  { %908 = vmatmul.bf16.gmra.mxu3 %v796_v19 }
 0x244   :  { %v713_v27 = vpop.f32.mrf.mxu2 }
 0x245   :  { %v714_v46 = vadd.f32 %v713_v27, %v625_v7 }
 0x246   :  { %v1913_v32 = vpop.f32.mrf.mxu3 }
 0x247   :  { %v772_v53 = vmax.f32 %v714_v46, 0.0 }
 0x24c   :  { %v715_v33 = vpop.f32.mrf.mxu2 }
 0x24d   :  { %v716_v50 = vadd.f32 %v715_v33, %v627_v45 }
 0x24f   :  { %v773_v55 = vmax.f32 %v716_v50, 0.0  ;;  %v635_v50 = vadd.f32 %v1842_v41, %v1850_v59  ;;  %v640_v59 = vadd.f32 %v1842_v41, %v1859_v26  ;;  %v645_v26 = vadd.f32 %v1842_v41, %v1869_v63 }
 0x250   :  { %v650_v63 = vadd.f32 %v1842_v41, %v1879_v35  ;;  %v657_v35 = vadd.f32 %v1842_v41, %v1894_v47 }
 0x251   :  { %v797_v60 = vpack.c.bf16 %v773_v55, %v772_v53 }
 0x253   :  { %913 = vmatmul.bf16.gmra.mxu3 %v797_v60 }
 0x254   :  { %v718_v0 = vpop.f32.mrf.mxu2 }
 0x255   :  { %v719_v9 = vadd.f32 %v718_v0, %v630_v1 }
 0x257   :  { %v774_v27 = vmax.f32 %v719_v9, 0.0 }
 0x25c   :  { %v720_v13 = vpop.f32.mrf.mxu2 }
 0x25d   :  { %v721_v19 = vadd.f32 %v720_v13, %v632_v8 }
 0x25f   :  { %v775_v7 = vmax.f32 %v721_v19, 0.0 }
 0x261   :  { %v798_v45 = vpack.c.bf16 %v775_v7, %v774_v27 }
 0x263   :  { %918 = vmatmul.bf16.gmra.mxu3 %v798_v45 }
 0x264   :  { %v723_v46 = vpop.f32.mrf.mxu2 }
 0x265   :  { %v724_v53 = vadd.f32 %v723_v46, %v635_v50 }
 0x266   :  { %v1915_v33 = vpop.f32.mrf.mxu3 }
 0x267   :  { %v776_v0 = vmax.f32 %v724_v53, 0.0 }
 0x26c   :  { %v725_v44 = vpop.f32.mrf.mxu2 }
 0x26d   :  { %v726_v55 = vadd.f32 %v725_v44, %v637_v37 }
 0x26e   :  { %v1921_v60 = vpop.f32.mrf.mxu3 }
 0x26f   :  { %v777_v1 = vmax.f32 %v726_v55, 0.0 }
 0x271   :  { %v799_v9 = vpack.c.bf16 %v777_v1, %v776_v0 }
 0x273   :  { %923 = vmatmul.bf16.gmra.mxu3 %v799_v9 }
 0x274   :  { %v728_v13 = vpop.f32.mrf.mxu2 }
 0x275   :  { %v729_v27 = vadd.f32 %v728_v13, %v640_v59 }
 0x276   :  { %v1925_v19 = vpop.f32.mrf.mxu3 }
 0x277   :  { %v778_v50 = vmax.f32 %v729_v27, 0.0 }
 0x27c   :  { %v730_v7 = vpop.f32.mrf.mxu2 }
 0x27d   :  { %v731_v45 = vadd.f32 %v730_v7, %v642_v2 }
 0x27e   :  { %v1931_v46 = vpop.f32.mrf.mxu3 }
 0x27f   :  { %v779_v37 = vmax.f32 %v731_v45, 0.0 }
 0x281   :  { %v800_v44 = vpack.c.bf16 %v779_v37, %v778_v50 }
 0x283   :  { %928 = vmatmul.bf16.gmra.mxu3 %v800_v44 }
 0x284   :  { %v733_v55 = vpop.f32.mrf.mxu2 }
 0x285   :  { %v734_v1 = vadd.f32 %v733_v55, %v645_v26 }
 0x286   :  { %v1935_v0 = vpop.f32.mrf.mxu3 }
 0x287   :  { %v780_v2 = vmax.f32 %v734_v1, 0.0 }
 0x28c   :  { %v735_v9 = vpop.f32.mrf.mxu2 }
 0x28d   :  { %v736_v13 = vadd.f32 %v735_v9, %v647_v42 }
 0x28e   :  { %v1941_v59 = vpop.f32.mrf.mxu3 }
 0x28f   :  { %v781_v27 = vmax.f32 %v736_v13, 0.0 }
 0x291   :  { %v801_v45 = vpack.c.bf16 %v781_v27, %v780_v2  ;;  %v655_v27 = vadd.f32 %v1842_v41, %v1889_v24 }
 0x293   :  { %933 = vmatmul.bf16.gmra.mxu3 %v801_v45 }
 0x294   :  { %v738_v50 = vpop.f32.mrf.mxu2 }
 0x295   :  { %v739_v44 = vadd.f32 %v738_v50, %v650_v63 }
 0x296   :  { %v894_v37 = vpop.f32.mrf.mxu3 }
 0x297   :  { %v782_v9 = vmax.f32 %v739_v44, 0.0 }
 0x29c   :  { %v740_v55 = vpop.f32.mrf.mxu2 }
 0x29d   :  { %v741_v26 = vadd.f32 %v740_v55, %v652_v15 }
 0x29e   :  { %v896_v42 = vpop.f32.mrf.mxu3 }
 0x29f   :  { %v783_v1 = vmax.f32 %v741_v26, 0.0  ;;  %v962_v13 = vpack.c.bf16 %v896_v42, %v894_v37  ;;  %v662_v26 = vadd.f32 %v1842_v41, %v1904_v38 }
 0x2a1   :  { %v802_v8 = vpack.c.bf16 %v783_v1, %v782_v9 }
 0x2a3   :  { %938 = vmatmul.bf16.gmra.mxu3 %v802_v8  ;;  %v660_v8 = vadd.f32 %v1842_v41, %v1900_v18 }
 0x2a4   :  { %v743_v53 = vpop.f32.mrf.mxu2 }
 0x2a5   :  { %v744_v45 = vadd.f32 %v743_v53, %v655_v27 }
 0x2a6   :  { %v899_v2 = vpop.f32.mrf.mxu3 }
 0x2a7   :  { %v784_v63 = vmax.f32 %v744_v45, 0.0  ;;  %v665_v45 = vadd.f32 %v1842_v41, %v1907_v62 }
 0x2ac   :  { %v745_v7 = vpop.f32.mrf.mxu2 }
 0x2ad   :  { %v746_v3 = vadd.f32 %v745_v7, %v657_v35 }
 0x2ae   :  { %v901_v50 = vpop.f32.mrf.mxu3 }
 0x2af   :  { %v785_v15 = vmax.f32 %v746_v3, 0.0  ;;  %v667_v3 = vadd.f32 %v1842_v41, %v1913_v32  ;;  %v963_v62 = vpack.c.bf16 %v901_v50, %v899_v2 }
 0x2b1   :  { %v803_v55 = vpack.c.bf16 %v785_v15, %v784_v63 }
 0x2b3   :  { %943 = vmatmul.bf16.gmra.mxu3 %v803_v55 }
 0x2b4   :  { %v748_v44 = vpop.f32.mrf.mxu2 }
 0x2b5   :  { %v749_v24 = vadd.f32 %v748_v44, %v660_v8 }
 0x2b6   :  { %v904_v37 = vpop.f32.mrf.mxu3 }
 0x2b7   :  { %v786_v53 = vmax.f32 %v749_v24, 0.0 }
 0x2bc   :  { %v750_v42 = vpop.f32.mrf.mxu2 }
 0x2bd   :  { %v751_v9 = vadd.f32 %v750_v42, %v662_v26 }
 0x2be   :  { %v906_v47 = vpop.f32.mrf.mxu3 }
 0x2bf   :  { %v787_v1 = vmax.f32 %v751_v9, 0.0 }
 0x2c1   :  { %v804_v7 = vpack.c.bf16 %v787_v1, %v786_v53  ;;  %v964_v1 = vpack.c.bf16 %v906_v47, %v904_v37 }
 0x2c3   :  { %948 = vmatmul.bf16.gmra.mxu3 %v804_v7  ;;  %v2052_v7 = vpack.c.bf16 %v1941_v59, %v1935_v0 }
 0x2c4   :  { %v753_v27 = vpop.f32.mrf.mxu2 }
 0x2c5   :  { %v754_v18 = vadd.f32 %v753_v27, %v665_v45  ;;  %v2053_v45 = vpack.c.bf16 %v1931_v46, %v1925_v19 }
 0x2c6   :  { %v909_v35 = vpop.f32.mrf.mxu3 }
 0x2c7   :  { %v788_v55 = vmax.f32 %v754_v18, 0.0 }
 0x2cc   :  { %v755_v63 = vpop.f32.mrf.mxu2 }
 0x2cd   :  { %v756_v15 = vadd.f32 %v755_v63, %v667_v3 }
 0x2ce   :  { %v911_v38 = vpop.f32.mrf.mxu3 }
 0x2cf   :  { %v789_v44 = vmax.f32 %v756_v15, 0.0  ;;  %v965_v9 = vpack.c.bf16 %v911_v38, %v909_v35  ;;  %v2054_v35 = vpack.c.bf16 %v1921_v60, %v1915_v33 }
 0x2d1   :  { %v805_v8 = vpack.c.bf16 %v789_v44, %v788_v55 }
 0x2d3   :  { %953 = vmatmul.bf16.gmra.mxu3 %v805_v8 }
 0x2d6   :  { %v914_v26 = vpop.f32.mrf.mxu3 }
 0x2de   :  { %v916_v24 = vpop.f32.mrf.mxu3 }
 0x2df   :  { %v966_v42 = vpack.c.bf16 %v916_v24, %v914_v26 }
 0x2e1   :  { %979 = vmatpush.bf16.msrb.mxu0 %v966_v42 }
 0x2e5   :  { %980 = vmatpush.bf16.msrb.mxu0 %v965_v9 }
 0x2e6   :  { %v919_v53 = vpop.f32.mrf.mxu3 }
 0x2e9   :  { %981 = vmatpush.bf16.msrb.mxu0 %v964_v1 }
 0x2ed   :  { %982 = vmatpush.bf16.msrb.mxu0 %v963_v62 }
 0x2ee   :  { %v921_v41 = vpop.f32.mrf.mxu3 }
 0x2ef   :  { %v967_v32 = vpack.c.bf16 %v921_v41, %v919_v53 }
 0x2f1   :  { %983 = vmatpush.bf16.msrb.mxu0 %v962_v13 }
 0x2f5   :  { %984 = vmatpush.bf16.msrb.mxu0 %v2052_v7 }
 0x2f6   :  { %v924_v27 = vpop.f32.mrf.mxu3 }
 0x2f9   :  { %985 = vmatpush.bf16.msrb.mxu0 %v2053_v45 }
 0x2fd   :  { %986 = vmatpush.bf16.msrb.mxu0 %v2054_v35 }
 0x2fe   :  { %v926_v37 = vpop.f32.mrf.mxu3 }
 0x2ff   :  { %v968_v47 = vpack.c.bf16 %v926_v37, %v924_v27 }
 0x300   :  { %987 = vmatmul.bf16.vlgmr.msrb.gmra.mxu0 %v1758_v10 }
 0x306   :  { %v929_v2 = vpop.f32.mrf.mxu3 }
 0x30e   :  { %v931_v50 = vpop.f32.mrf.mxu3 }
 0x30f   :  { %v969_v13 = vpack.c.bf16 %v931_v50, %v929_v2 }
 0x310   :  { %992 = vmatmul.bf16.gmra.mxu0 %v1771_v21 }
 0x316   :  { %v934_v0 = vpop.f32.mrf.mxu3 }
 0x31e   :  { %v936_v59 = vpop.f32.mrf.mxu3 }
 0x31f   :  { %v970_v3 = vpack.c.bf16 %v936_v59, %v934_v0 }
 0x320   :  { %997 = vmatmul.bf16.gmra.mxu0 %v1780_v30 }
 0x326   :  { %v939_v19 = vpop.f32.mrf.mxu3 }
 0x32e   :  { %v941_v46 = vpop.f32.mrf.mxu3 }
 0x32f   :  { %v971_v55 = vpack.c.bf16 %v941_v46, %v939_v19 }
 0x330   :  { %1002 = vmatmul.bf16.gmra.mxu0 %v1789_v39 }
 0x336   :  { %v944_v33 = vpop.f32.mrf.mxu3 }
 0x33e   :  { %v946_v60 = vpop.f32.mrf.mxu3 }
 0x33f   :  { %v972_v30 = vpack.c.bf16 %v946_v60, %v944_v33 }
 0x340   :  { %1007 = vmatmul.bf16.gmra.mxu0 %v1798_v48 }
 0x346   :  { %v949_v18 = vpop.f32.mrf.mxu3 }
 0x34e   :  { %v951_v10 = vpop.f32.mrf.mxu3 }
 0x34f   :  { %v973_v38 = vpack.c.bf16 %v951_v10, %v949_v18 }
 0x350   :  { %1012 = vmatmul.bf16.gmra.mxu0 %v1807_v57 }
 0x356   :  { %v954_v63 = vpop.f32.mrf.mxu3 }
 0x35e   :  { %v956_v15 = vpop.f32.mrf.mxu3 }
 0x35f   :  { %v974_v21 = vpack.c.bf16 %v956_v15, %v954_v63 }
 0x360   :  { %1017 = vmatmul.bf16.gmra.mxu0 %v1816_v4 }
 0x361   :  { %1068 = vmatpush.bf16.msrb.mxu1 %v974_v21 }
 0x365   :  { %1069 = vmatpush.bf16.msrb.mxu1 %v973_v38 }
 0x369   :  { %1070 = vmatpush.bf16.msrb.mxu1 %v972_v30 }
 0x36d   :  { %1071 = vmatpush.bf16.msrb.mxu1 %v971_v55 }
 0x370   :  { %1022 = vmatmul.bf16.gmra.mxu0 %v1825_v20 }
 0x371   :  { %1072 = vmatpush.bf16.msrb.mxu1 %v970_v3 }
 0x375   :  { %1073 = vmatpush.bf16.msrb.mxu1 %v969_v13 }
 0x379   :  { %1074 = vmatpush.bf16.msrb.mxu1 %v968_v47 }
 0x37d   :  { %1075 = vmatpush.bf16.msrb.mxu1 %v967_v32  ;;  %v988_v39 = vpop.f32.mrf.mxu0 }
 0x380   :  { %1076 = vmatmul.bf16.vlgmr.msrb.gmra.mxu1 %v1768_v16  ;;  %1027 = vmatmul.bf16.gmra.mxu0 %v1760_v11 }
 0x385   :  { %v990_v16 = vpop.f32.mrf.mxu0 }
 0x38d   :  { %v993_v11 = vpop.f32.mrf.mxu0 }
 0x390   :  { %1081 = vmatmul.bf16.gmra.mxu1 %v1777_v25  ;;  %1032 = vmatmul.bf16.gmra.mxu0 %v1773_v22 }
 0x395   :  { %v995_v22 = vpop.f32.mrf.mxu0 }
 0x39d   :  { %v998_v25 = vpop.f32.mrf.mxu0 }
 0x3a0   :  { %1086 = vmatmul.bf16.gmra.mxu1 %v1786_v34  ;;  %1037 = vmatmul.bf16.gmra.mxu0 %v1782_v31  ;;  %v1995_v31 = vld [vmem:[%s2050_s5] ss:$0 sm:$0xff]  ;;  %s1693_s5 = smov [#allocation10]  }
 0x3a1   :  { %v989_v34 = vadd.f32 %v1995_v31, %v988_v39  ;;  %v999_v8 = vadd.f32 %v1995_v31, %v998_v25  ;;  %s1193_s20 = sshll.u32 %s1693_s5, 4  ;;  %s1194_s20 = int_to_ptr.vmem [resolvable:$true] %s1193_s20 }
 0x3b0   :  { %1091 = vmatmul.bf16.gmra.mxu1 %v1795_v43  ;;  %1042 = vmatmul.bf16.gmra.mxu0 %v1791_v40  ;;  %v1000_v40 = vpop.f32.mrf.mxu0 }
 0x3b1   :  { %v1001_v9 = vadd.f32 %v1995_v31, %v1000_v40 }
 0x3c0   :  { %1096 = vmatmul.bf16.gmra.mxu1 %v1804_v52  ;;  %1047 = vmatmul.bf16.gmra.mxu0 %v1800_v49  ;;  %v1003_v49 = vpop.f32.mrf.mxu0  ;;  %v991_v52 = vadd.f32 %v1995_v31, %v990_v16 }
 0x3c8   :  { %v1005_v4 = vpop.f32.mrf.mxu0 }
 0x3c9   :  { %v1006_v27 = vadd.f32 %v1995_v31, %v1005_v4 }
 0x3d0   :  { %1101 = vmatmul.bf16.gmra.mxu1 %v1813_v61  ;;  %1052 = vmatmul.bf16.gmra.mxu0 %v1809_v58  ;;  %v994_v61 = vadd.f32 %v1995_v31, %v993_v11 }
 0x3e0   :  { %1106 = vmatmul.bf16.gmra.mxu1 %v1822_v12  ;;  %1057 = vmatmul.bf16.gmra.mxu0 %v1818_v5  ;;  %v1008_v5 = vpop.f32.mrf.mxu0 }
 0x3e8   :  { %v1010_v26 = vpop.f32.mrf.mxu0 }
 0x3e9   :  { %v1011_v50 = vadd.f32 %v1995_v31, %v1010_v26 }
 0x3f0   :  { %1111 = vmatmul.bf16.gmra.mxu1 %v1831_v28  ;;  %1062 = vmatmul.bf16.gmra.mxu0 %v1827_v23  ;;  %v996_v28 = vadd.f32 %v1995_v31, %v995_v22  ;;  %v1013_v23 = vpop.f32.mrf.mxu0 }
 0x3f8   :  { %v1015_v62 = vpop.f32.mrf.mxu0 }
 0x3f9   :  { %v1016_v33 = vadd.f32 %v1995_v31, %v1015_v62 }
 0x3fd   :  { %v1077_v43 = vpop.f32.mrf.mxu1 }
 0x3fe   :  { %v1078_v48 = vadd.f32 %v1077_v43, %v989_v34 }
 0x400   :  { %1157 = vst [vmem:[#allocation10] sm:$0xff] %v1078_v48  ;;  %1116 = vmatmul.bf16.gmra.mxu1 %v1834_v36  ;;  %v1018_v7 = vpop.f32.mrf.mxu0 }
 0x405   :  { %v1079_v57 = vpop.f32.mrf.mxu1 }
 0x406   :  { %v1080_v58 = vadd.f32 %v1079_v57, %v991_v52 }
 0x408   :  { %1158 = vst [vmem:[#allocation10 + $0x8] sm:$0xff] %v1080_v58  ;;  %v1020_v47 = vpop.f32.mrf.mxu0 }
 0x409   :  { %v1021_v21 = vadd.f32 %v1995_v31, %v1020_v47 }
 0x40d   :  { %v1082_v12 = vpop.f32.mrf.mxu1 }
 0x40e   :  { %v1083_v20 = vadd.f32 %v1082_v12, %v994_v61 }
 0x410   :  { %1159 = vst [vmem:[#allocation10 + $0x10] sm:$0xff] %v1083_v20  ;;  %1121 = vmatmul.bf16.gmra.mxu1 %v1848_v56  ;;  %v1004_v56 = vadd.f32 %v1995_v31, %v1003_v49  ;;  %v1023_v59 = vpop.f32.mrf.mxu0 }
 0x415   :  { %v1084_v36 = vpop.f32.mrf.mxu1 }
 0x416   :  { %v1085_v44 = vadd.f32 %v1084_v36, %v996_v28 }
 0x418   :  { %1160 = vst [vmem:[#allocation10 + $0x18] sm:$0xff] %v1085_v44  ;;  %v1025_v46 = vpop.f32.mrf.mxu0 }
 0x419   :  { %v1026_v22 = vadd.f32 %v1995_v31, %v1025_v46 }
 0x41d   :  { %v1087_v24 = vpop.f32.mrf.mxu1 }
 0x41e   :  { %v1088_v42 = vadd.f32 %v1087_v24, %v999_v8 }
 0x420   :  { %1161 = vst [vmem:[#allocation10 + $0x20] sm:$0xff] %v1088_v42  ;;  %1126 = vmatmul.bf16.gmra.mxu1 %v1857_v17  ;;  %v1009_v17 = vadd.f32 %v1995_v31, %v1008_v5  ;;  %v1028_v10 = vpop.f32.mrf.mxu0 }
 0x421   :  { %v1029_v40 = vadd.f32 %v1995_v31, %v1028_v10 }
 0x425   :  { %v1089_v53 = vpop.f32.mrf.mxu1 }
 0x426   :  { %v1090_v1 = vadd.f32 %v1089_v53, %v1001_v9 }
 0x428   :  { %1162 = vst [vmem:[#allocation10 + $0x28] sm:$0xff] %v1090_v1  ;;  %v1030_v30 = vpop.f32.mrf.mxu0 }
 0x429   :  { %v1031_v52 = vadd.f32 %v1995_v31, %v1030_v30 }
 0x42d   :  { %v1092_v41 = vpop.f32.mrf.mxu1 }
 0x42e   :  { %v1093_v32 = vadd.f32 %v1092_v41, %v1004_v56 }
 0x430   :  { %1163 = vst [vmem:[#allocation10 + $0x30] sm:$0xff] %v1093_v32  ;;  %1131 = vmatmul.bf16.gmra.mxu1 %v1866_v51  ;;  %v1014_v51 = vadd.f32 %v1995_v31, %v1013_v23  ;;  %v1033_v11 = vpop.f32.mrf.mxu0 }
 0x431   :  { %v1034_v61 = vadd.f32 %v1995_v31, %v1033_v11 }
 0x435   :  { %v1094_v45 = vpop.f32.mrf.mxu1 }
 0x436   :  { %v1095_v35 = vadd.f32 %v1094_v45, %v1006_v27 }
 0x438   :  { %1164 = vst [vmem:[#allocation10 + $0x38] sm:$0xff] %v1095_v35 }
 0x43d   :  { %v1097_v37 = vpop.f32.mrf.mxu1 }
 0x43e   :  { %v1098_v2 = vadd.f32 %v1097_v37, %v1009_v17 }
 0x440   :  { %1165 = vst [vmem:[#allocation10 + $0x40] sm:$0xff] %v1098_v2  ;;  %1136 = vmatmul.bf16.gmra.mxu1 %v1873_v14  ;;  %v1019_v14 = vadd.f32 %v1995_v31, %v1018_v7 }
 0x445   :  { %v1099_v13 = vpop.f32.mrf.mxu1 }
 0x446   :  { %v1100_v0 = vadd.f32 %v1099_v13, %v1011_v50 }
 0x448   :  { %1166 = vst [vmem:[#allocation10 + $0x48] sm:$0xff] %v1100_v0 }
 0x44d   :  { %v1102_v3 = vpop.f32.mrf.mxu1 }
 0x44e   :  { %v1103_v19 = vadd.f32 %v1102_v3, %v1014_v51 }
 0x450   :  { %1167 = vst [vmem:[#allocation10 + $0x50] sm:$0xff] %v1103_v19  ;;  %1141 = vmatmul.bf16.gmra.mxu1 %v1882_v54  ;;  %v1024_v54 = vadd.f32 %v1995_v31, %v1023_v59 }
 0x455   :  { %v1104_v60 = vpop.f32.mrf.mxu1 }
 0x456   :  { %v1105_v18 = vadd.f32 %v1104_v60, %v1016_v33 }
 0x458   :  { %1168 = vst [vmem:[#allocation10 + $0x58] sm:$0xff] %v1105_v18 }
 0x45d   :  { %v1107_v63 = vpop.f32.mrf.mxu1 }
 0x45e   :  { %v1108_v15 = vadd.f32 %v1107_v63, %v1019_v14 }
 0x460   :  { %1169 = vst [vmem:[#allocation10 + $0x60] sm:$0xff] %v1108_v15  ;;  %1146 = vmatmul.bf16.gmra.mxu1 %v1891_v29  ;;  %v1035_v29 = vpop.f32.mrf.mxu0 }
 0x461   :  { %v1036_v20 = vadd.f32 %v1995_v31, %v1035_v29 }
 0x465   :  { %v1109_v38 = vpop.f32.mrf.mxu1 }
 0x466   :  { %v1110_v55 = vadd.f32 %v1109_v38, %v1021_v21 }
 0x468   :  { %1170 = vst [vmem:[#allocation10 + $0x68] sm:$0xff] %v1110_v55  ;;  %v1038_v49 = vpop.f32.mrf.mxu0 }
 0x469   :  { %v1039_v44 = vadd.f32 %v1995_v31, %v1038_v49 }
 0x46d   :  { %v1112_v39 = vpop.f32.mrf.mxu1 }
 0x46e   :  { %v1113_v16 = vadd.f32 %v1112_v39, %v1024_v54 }
 0x470   :  { %1171 = vst [vmem:[#allocation10 + $0x70] sm:$0xff] %v1113_v16  ;;  %1151 = vmatmul.bf16.gmra.mxu1 %v1898_v6  ;;  %v1040_v4 = vpop.f32.mrf.mxu0 }
 0x471   :  { %v1041_v42 = vadd.f32 %v1995_v31, %v1040_v4 }
 0x475   :  { %v1114_v25 = vpop.f32.mrf.mxu1 }
 0x476   :  { %v1115_v34 = vadd.f32 %v1114_v25, %v1026_v22 }
 0x478   :  { %1172 = vst [vmem:[#allocation10 + $0x78] sm:$0xff] %v1115_v34  ;;  %v1043_v36 = vpop.f32.mrf.mxu0 }
 0x479   :  { %v1044_v53 = vadd.f32 %v1995_v31, %v1043_v36 }
 0x47d   :  { %v1117_v43 = vpop.f32.mrf.mxu1 }
 0x47e   :  { %v1118_v48 = vadd.f32 %v1117_v43, %v1029_v40 }
 0x480   :  { %1173 = vst [vmem:[#allocation10 + $0x80] sm:$0xff] %v1118_v48  ;;  %v1045_v24 = vpop.f32.mrf.mxu0 }
 0x481   :  { %v1046_v41 = vadd.f32 %v1995_v31, %v1045_v24 }
 0x485   :  { %v1119_v57 = vpop.f32.mrf.mxu1 }
 0x486   :  { %v1120_v58 = vadd.f32 %v1119_v57, %v1031_v52 }
 0x488   :  { %1174 = vst [vmem:[#allocation10 + $0x88] sm:$0xff] %v1120_v58  ;;  %v1048_v1 = vpop.f32.mrf.mxu0 }
 0x489   :  { %v1049_v45 = vadd.f32 %v1995_v31, %v1048_v1 }
 0x48d   :  { %v1122_v6 = vpop.f32.mrf.mxu1 }
 0x48e   :  { %v1123_v12 = vadd.f32 %v1122_v6, %v1034_v61 }
 0x490   :  { %1175 = vst [vmem:[#allocation10 + $0x90] sm:$0xff] %v1123_v12  ;;  %v1050_v7 = vpop.f32.mrf.mxu0 }
 0x491   :  { %v1051_v47 = vadd.f32 %v1995_v31, %v1050_v7 }
 0x495   :  { %v1124_v5 = vpop.f32.mrf.mxu1 }
 0x496   :  { %v1125_v28 = vadd.f32 %v1124_v5, %v1036_v20 }
 0x498   :  { %1176 = vst [vmem:[#allocation10 + $0x98] sm:$0xff] %v1125_v28  ;;  %v1053_v37 = vpop.f32.mrf.mxu0 }
 0x499   :  { %v1054_v0 = vadd.f32 %v1995_v31, %v1053_v37 }
 0x49d   :  { %v1127_v8 = vpop.f32.mrf.mxu1 }
 0x49e   :  { %v1128_v26 = vadd.f32 %v1127_v8, %v1039_v44 }
 0x4a0   :  { %1177 = vst [vmem:[#allocation10 + $0xa0] sm:$0xff] %v1128_v26  ;;  %v1055_v13 = vpop.f32.mrf.mxu0 }
 0x4a1   :  { %v1056_v19 = vadd.f32 %v1995_v31, %v1055_v13 }
 0x4a5   :  { %v1129_v23 = vpop.f32.mrf.mxu1 }
 0x4a6   :  { %v1130_v9 = vadd.f32 %v1129_v23, %v1041_v42 }
 0x4a8   :  { %1178 = vst [vmem:[#allocation10 + $0xa8] sm:$0xff] %v1130_v9  ;;  %v1058_v3 = vpop.f32.mrf.mxu0 }
 0x4a9   :  { %v1059_v60 = vadd.f32 %v1995_v31, %v1058_v3 }
 0x4ad   :  { %v1132_v56 = vpop.f32.mrf.mxu1 }
 0x4ae   :  { %v1133_v62 = vadd.f32 %v1132_v56, %v1044_v53 }
 0x4b0   :  { %1179 = vst [vmem:[#allocation10 + $0xb0] sm:$0xff] %v1133_v62  ;;  %v1060_v14 = vpop.f32.mrf.mxu0 }
 0x4b1   :  { %v1061_v63 = vadd.f32 %v1995_v31, %v1060_v14 }
 0x4b5   :  { %v1134_v32 = vpop.f32.mrf.mxu1 }
 0x4b6   :  { %v1135_v27 = vadd.f32 %v1134_v32, %v1046_v41 }
 0x4b8   :  { %1180 = vst [vmem:[#allocation10 + $0xb8] sm:$0xff] %v1135_v27  ;;  %v1063_v38 = vpop.f32.mrf.mxu0 }
 0x4b9   :  { %v1064_v30 = vadd.f32 %v1995_v31, %v1063_v38 }
 0x4bd   :  { %v1137_v35 = vpop.f32.mrf.mxu1 }
 0x4be   :  { %v1138_v17 = vadd.f32 %v1137_v35, %v1049_v45 }
 0x4c0   :  { %1181 = vst [vmem:[#allocation10 + $0xc0] sm:$0xff] %v1138_v17  ;;  %v1065_v39 = vpop.f32.mrf.mxu0 }
 0x4c1   :  { %v1066_v16 = vadd.f32 %v1995_v31, %v1065_v39 }
 0x4c5   :  { %v1139_v2 = vpop.f32.mrf.mxu1 }
 0x4c6   :  { %v1140_v50 = vadd.f32 %v1139_v2, %v1051_v47 }
 0x4c8   :  { %1182 = vst [vmem:[#allocation10 + $0xc8] sm:$0xff] %v1140_v50 }
 0x4cd   :  { %v1142_v59 = vpop.f32.mrf.mxu1 }
 0x4ce   :  { %v1143_v51 = vadd.f32 %v1142_v59, %v1054_v0 }
 0x4d0   :  { %1183 = vst [vmem:[#allocation10 + $0xd0] sm:$0xff] %v1143_v51 }
 0x4d5   :  { %v1144_v46 = vpop.f32.mrf.mxu1 }
 0x4d6   :  { %v1145_v33 = vadd.f32 %v1144_v46, %v1056_v19 }
 0x4d8   :  { %1184 = vst [vmem:[#allocation10 + $0xd8] sm:$0xff] %v1145_v33 }
 0x4dd   :  { %v1147_v18 = vpop.f32.mrf.mxu1 }
 0x4de   :  { %v1148_v10 = vadd.f32 %v1147_v18, %v1059_v60 }
 0x4e0   :  { %1185 = vst [vmem:[#allocation10 + $0xe0] sm:$0xff] %v1148_v10 }
 0x4e5   :  { %v1149_v15 = vpop.f32.mrf.mxu1 }
 0x4e6   :  { %v1150_v21 = vadd.f32 %v1149_v15, %v1061_v63 }
 0x4e8   :  { %1186 = vst [vmem:[#allocation10 + $0xe8] sm:$0xff] %v1150_v21 }
 0x4ed   :  { %v1152_v55 = vpop.f32.mrf.mxu1 }
 0x4ee   :  { %v1153_v54 = vadd.f32 %v1152_v55, %v1064_v30 }
 0x4f0   :  { %1187 = vst [vmem:[#allocation10 + $0xf0] sm:$0xff] %v1153_v54 }
 0x4f5   :  { %v1154_v11 = vpop.f32.mrf.mxu1 }
 0x4f6   :  { %v1155_v22 = vadd.f32 %v1154_v11, %v1066_v16 }
 0x4f8   :  { %1188 = vst [vmem:[#allocation10 + $0xf8] sm:$0xff] %v1155_v22 }
 0x4f9   :  { %1201 = dma.vmem_to_hbm [thread:$0]  %s1194_s20, 4096, %s1196_s23, [#allocation4], %s1689_s9, %s1689_s9, %s1690_s10  }
 0x4fa   :  { %1683 = dma.done.wait [#allocation4], 4096  }
 0x4fb   :  { %1684 = vsyncadd [#allocation4], 4294963200 }
 0x4fc   :  { %1206 = vsyncpa [#allocation3], 1 }
 0x4fd   :  { %1207 = vsyncpa [#allocation6], 1 }
 0x4fe   :  { %1208 = vsyncpa [#allocation9], 1 }
 0x4ff   :  { %1209 = vsyncpa [#allocation4], 1 }

</bundles_post_ra>
